<compile_context>
chip_gen: v5e
topology: v5e:2x2
jax: 0.10.0
libtpu: 0.0.40
codegen_flags: <defaults>
</compile_context>

<pallas_src>
import jax
import jax.numpy as jnp
import numpy as np
from jax.experimental import pallas as pl
from jax.experimental.pallas import tpu as pltpu


# ----------------------------------------------------------------------------
# Deterministic parameter initialization (mirrors get_pos_embed / get_tokens)
# ----------------------------------------------------------------------------
def get_2d_sincos_pos_embed(embed_dim: int, grid_size: tuple[int, int]) -> jnp.ndarray:
    """Standard MAE 2D sin-cos positional embedding, (H*W, embed_dim)."""
    assert embed_dim % 4 == 0
    gh, gw = grid_size
    dim_half = embed_dim // 2  # per axis
    omega = np.arange(dim_half // 2, dtype=np.float64) / (dim_half / 2.0)
    omega = 1.0 / (10000.0 ** omega)  # (dim_half/2,)

    def emb_1d(pos):  # pos: (N,)
        out = np.einsum("n,d->nd", pos, omega)  # (N, dim_half/2)
        return np.concatenate([np.sin(out), np.cos(out)], axis=1)  # (N, dim_half)

    grid_h = np.arange(gh, dtype=np.float64)
    grid_w = np.arange(gw, dtype=np.float64)
    ww, hh = np.meshgrid(grid_w, grid_h)  # each (gh, gw)
    emb_h = emb_1d(hh.reshape(-1))
    emb_w = emb_1d(ww.reshape(-1))
    pe = np.concatenate([emb_h, emb_w], axis=1)  # (gh*gw, embed_dim)
    return jnp.asarray(pe, dtype=jnp.float32)


def get_tokens(key, embed_dim: int, n_tokens: int = 1) -> jnp.ndarray:
    """Learnable token init (trunc-normal-ish), (1, n_tokens, embed_dim)."""
    return (0.02 * jax.random.normal(key, (1, n_tokens, embed_dim))).astype(jnp.float32)


# ----------------------------------------------------------------------------
# Pallas kernel
# ----------------------------------------------------------------------------
def _decoder_embed_kernel(
    x_ref,         # (BT, n_keep, D)      visible tokens (activation dtype)
    dest_ref,      # (BT, 1, n_patches)   destination slot of every patch (int32)
    pe_ref,        # (n_patches, D)       pos_embed (+ folded embed_token)  (f32)
    mask_add_ref,  # (1, 1, D)            mask_token                        (f32)
    xvis_ref,      # out: (BT, n_keep, D)
    xmask_ref,     # out: (BT, n_masked, D)
):
    bt, n_keep, d = x_ref.shape
    n_patches = pe_ref.shape[0]
    n_masked = xmask_ref.shape[1]

    # bf16 gather when the outputs are bf16 (one-hot values are exact in bf16 so
    # the selection is unchanged; ~4x fewer MXU passes vs f32). Keep f32 when the
    # outputs are f32 so the sin/cos pos-embed stays exact vs the reference.
    gather_dtype = jnp.bfloat16 if xvis_ref.dtype == jnp.bfloat16 else jnp.float32

    dest = dest_ref[...]                                   # (bt, 1, n_patches) int32
    pe = pe_ref[...].astype(gather_dtype)                  # (n_patches, d)

    # Visible slots: onehot_vis[b, r, p] = (dest[b, p] == r), r in [0, n_keep).
    # The iota has a size-1 leading dim (broadcast over bt — no (bt, P, P) iota).
    rows_vis = jax.lax.broadcasted_iota(jnp.int32, (1, n_keep, n_patches), 1)
    onehot_vis = (dest == rows_vis).astype(gather_dtype)   # (bt, n_keep, n_patches)
    pe_vis = jnp.dot(
        onehot_vis.reshape(bt * n_keep, n_patches), pe,
        preferred_element_type=jnp.float32,
    ).reshape(bt, n_keep, d)                               # f32

    # Masked slots: slot = n_keep + r, r in [0, n_masked).
    rows_msk = n_keep + jax.lax.broadcasted_iota(jnp.int32, (1, n_masked, n_patches), 1)
    onehot_msk = (dest == rows_msk).astype(gather_dtype)   # (bt, n_masked, n_patches)
    pe_msk = jnp.dot(
        onehot_msk.reshape(bt * n_masked, n_patches), pe,
        preferred_element_type=jnp.float32,
    ).reshape(bt, n_masked, d)                             # f32

    # embed_token is already folded into pe in the wrapper, so the visible path
    # is a single add and the masked path only needs mask_token.
    xvis_ref[...] = (x_ref[...].astype(jnp.float32) + pe_vis).astype(xvis_ref.dtype)
    xmask_ref[...] = (pe_msk + mask_add_ref[...]).astype(xmask_ref.dtype)


# ----------------------------------------------------------------------------
# Tiling / VMEM budgeting
# ----------------------------------------------------------------------------
def _vmem_limits():
    """Generation-aware (scoped vmem limit, per-step tile budget), in bytes."""
    phys = None
    try:
        info = pltpu.get_tpu_info()
        phys = getattr(info, "vmem_capacity_bytes", None)
    except Exception:
        phys = None
    if not phys:
        phys = 64 * 1024 * 1024          # conservative default: v7x has 64 MiB / TC
    if phys >= 128 * 1024 * 1024:        # v5e / v6e (128 MiB)
        limit = 48 * 1024 * 1024
    else:                                # v7x (64 MiB per TensorCore)
        limit = 40 * 1024 * 1024
    return limit, int(limit * 0.75)


def _choose_batch_tile(batch, n_keep, n_masked, n_patches, d,
                       act_itemsize, gather_itemsize, budget_bytes, min_steps=4):
    """Largest batch tile whose per-step VMEM footprint fits the budget.

    Capped so the grid has >= min_steps steps when batch allows (2+ steps per
    TensorCore on v7x restores pipeline overlap). No divisor requirement: the
    wrapper pads batch up to a multiple of the chosen tile.
    """
    if batch <= 1:
        return max(batch, 1)
    cap = max(1, -(-batch // min_steps))  # ceil(batch / min_steps)

    def vmem_estimate(bt):
        io_x = 2 * bt * n_keep * d * act_itemsize              # double-buffered input
        io_dest = 2 * bt * n_patches * 4
        io_out = 2 * bt * n_patches * d * act_itemsize          # both outputs, double-buffered
        onehot = bt * n_patches * n_patches * gather_itemsize   # vis + msk one-hots
        cmp_tmp = bt * n_patches * n_patches * 4                 # iota / compare intermediates
        gathered = bt * n_patches * d * 4                        # f32 matmul results
        add_tmp = bt * n_patches * d * 4                         # f32 adds before final cast
        resident = 2 * (n_patches * d + d) * 4                   # pe + mask_add (x2 buffers)
        return io_x + io_dest + io_out + onehot + cmp_tmp + gathered + add_tmp + resident

    bt = 1
    for cand in range(1, cap + 1):
        if vmem_estimate(cand) <= budget_bytes:
            bt = cand
    return bt


# ----------------------------------------------------------------------------
# Wrapper
# ----------------------------------------------------------------------------
def decoder_embedding_forward(x, enc_mask, pos_embed, mask_token, embed_token=None):
    """Pallas implementation of DecoderEmbedding.forward.

    Args:
        x: (batch, n_enc_keep, D) visible tokens (any float dtype; preserved).
        enc_mask: (batch, n_patches) int {0,1}; 0 = visible, 1 = masked.
            Precondition: every row has exactly n_enc_keep zeros (same contract
            as the PyTorch boolean-mask gather; violations give silently wrong
            rows rather than an error).
        pos_embed: (n_patches, D) float32.
        mask_token: (1, 1, D) float32.
        embed_token: (1, 1, D) float32, or None (add_embed_token=False).

    Returns:
        x_vis: (batch, n_enc_keep, D), x_mask: (batch, n_enc_masked, D), in x.dtype.
    """
    batch, n_keep, d = x.shape
    n_patches = enc_mask.shape[1]
    n_masked = n_patches - n_keep
    act_dtype = x.dtype
    act_itemsize = jnp.dtype(act_dtype).itemsize

    # Degenerate shapes produce zero-sized Pallas blocks; handle in plain JAX.
    if batch == 0 or n_keep == 0 or n_masked == 0:
        return decoder_embedding_ref(x, enc_mask, pos_embed, mask_token, embed_token)

    # Index prep WITHOUT a sort: destination slot of every patch.
    #   visible patch p -> slot (#visible patches <= p) - 1
    #   masked  patch p -> n_keep + (#masked patches <= p) - 1
    mask_i = enc_mask.astype(jnp.int32)
    cs_vis = jnp.cumsum(1 - mask_i, axis=1)
    cs_msk = jnp.cumsum(mask_i, axis=1)
    dest = jnp.where(mask_i == 0, cs_vis - 1, n_keep + cs_msk - 1).astype(jnp.int32)
    dest = dest[:, None, :]  # (batch, 1, n_patches)

    # Fold embed_token into pos_embed: visible rows become x + pe'[patch] and
    # masked rows become pe'[patch] + mask_token (== pe + emb + mask_token).
    pe = pos_embed.astype(jnp.float32)
    if embed_token is not None:
        pe = pe + embed_token.reshape(1, d).astype(jnp.float32)
    mask_add = mask_token.reshape(1, 1, d).astype(jnp.float32)

    vmem_limit, vmem_budget = _vmem_limits()
    gather_itemsize = 2 if act_dtype == jnp.bfloat16 else 4
    bt = _choose_batch_tile(batch, n_keep, n_masked, n_patches, d,
                            act_itemsize, gather_itemsize, vmem_budget)

    # Pad batch to a multiple of the tile (outputs sliced back afterwards) so
    # odd / prime batch sizes don't degenerate to BT=1.
    pad = (-batch) % bt
    pbatch = batch + pad
    if pad:
        x_in = jnp.pad(x, ((0, pad), (0, 0), (0, 0)))
        dest_in = jnp.pad(dest, ((0, pad), (0, 0), (0, 0)))
    else:
        x_in, dest_in = x, dest

    grid = (pbatch // bt,)

    cost = pl.CostEstimate(
        flops=2 * pbatch * n_patches * n_patches * d,
        transcendentals=0,
        bytes_accessed=(pbatch * n_keep * d * act_itemsize            # x in
                        + pbatch * n_patches * d * act_itemsize       # both outputs
                        + pbatch * n_patches * 4                      # dest
                        + n_patches * d * 4 + d * 4),                 # pe + mask_token
    )

    grid_spec = pltpu.PrefetchScalarGridSpec(
        num_scalar_prefetch=0,
        grid=grid,
        in_specs=[
            pl.BlockSpec((bt, n_keep, d), lambda b: (b, 0, 0)),       # x
            pl.BlockSpec((bt, 1, n_patches), lambda b: (b, 0, 0)),    # dest slots
            pl.BlockSpec((n_patches, d), lambda b: (0, 0)),           # pe (+emb), resident
            pl.BlockSpec((1, 1, d), lambda b: (0, 0, 0)),             # mask_token, resident
        ],
        out_specs=[
            pl.BlockSpec((bt, n_keep, d), lambda b: (b, 0, 0)),
            pl.BlockSpec((bt, n_masked, d), lambda b: (b, 0, 0)),
        ],
    )

    x_vis, x_mask = pl.pallas_call(
        _decoder_embed_kernel,
        out_shape=(
            jax.ShapeDtypeStruct((pbatch, n_keep, d), act_dtype),
            jax.ShapeDtypeStruct((pbatch, n_masked, d), act_dtype),
        ),
        grid_spec=grid_spec,
        compiler_params=pltpu.CompilerParams(
            dimension_semantics=("parallel",),
            vmem_limit_bytes=vmem_limit,
        ),
        cost_estimate=cost,
    )(x_in, dest_in, pe, mask_add)

    if pad:
        x_vis = x_vis[:batch]
        x_mask = x_mask[:batch]
    return x_vis, x_mask


# ----------------------------------------------------------------------------
# Pure-JAX reference (mirrors the PyTorch semantics) for verification
# ----------------------------------------------------------------------------
def decoder_embedding_ref(x, enc_mask, pos_embed, mask_token, embed_token=None):
    batch, n_keep, d = x.shape
    n_patches = enc_mask.shape[1]
    order = jnp.argsort(enc_mask.astype(jnp.int32), axis=1, stable=True)
    vis_idx = order[:, :n_keep][..., None]
    mask_idx = order[:, n_keep:][..., None]
    pe = pos_embed.astype(jnp.float32)
    dec_pe = jnp.broadcast_to(pe[None], (batch, n_patches, d))
    vis_pe = jnp.take_along_axis(dec_pe, vis_idx, axis=1)
    mask_pe = jnp.take_along_axis(dec_pe, mask_idx, axis=1)
    x_vis = x.astype(jnp.float32) + vis_pe
    x_mask = mask_token.reshape(1, 1, d).astype(jnp.float32) + mask_pe
    if embed_token is not None:
        e = embed_token.reshape(1, 1, d).astype(jnp.float32)
        x_vis = x_vis + e
        x_mask = x_mask + e
    return x_vis, x_mask


def _make_mask(key, batch, n_patches, n_keep):
    scores = jax.random.uniform(key, (batch, n_patches))
    ranks = jnp.argsort(jnp.argsort(scores, axis=1), axis=1)
    return (ranks >= n_keep).astype(jnp.int32)   # exactly n_keep zeros per row


if __name__ == "__main__":
    key = jax.random.PRNGKey(0)
    k_x1, k_m1, k_x2, k_m2, k_x3, k_m3, k_mt, k_et, k_mt2, k_et2 = jax.random.split(key, 10)

    fwd = jax.jit(decoder_embedding_forward)

    # --- Test 1: float32, D=32, batch=2, with embed_token -----------------------
    n_patches, dec_embed_dim, enc_grid = 16, 32, (4, 4)
    pos_embed = get_2d_sincos_pos_embed(dec_embed_dim, enc_grid)        # (16, 32)
    mask_token = get_tokens(k_mt, dec_embed_dim, 1)                     # (1, 1, 32)
    embed_token = get_tokens(k_et, dec_embed_dim, 1)                    # (1, 1, 32)

    batch, n_keep = 2, 8
    x = jax.random.normal(k_x1, (batch, n_keep, dec_embed_dim), dtype=jnp.float32)
    enc_mask = _make_mask(k_m1, batch, n_patches, n_keep)
    xv, xm = fwd(x, enc_mask, pos_embed, mask_token, embed_token)
    jax.block_until_ready((xv, xm))
    rv, rm = decoder_embedding_ref(x, enc_mask, pos_embed, mask_token, embed_token)
    np.testing.assert_allclose(np.asarray(xv), np.asarray(rv), rtol=1e-5, atol=1e-5)
    np.testing.assert_allclose(np.asarray(xm), np.asarray(rm), rtol=1e-5, atol=1e-5)

    # --- Test 2: bfloat16, D=128 (lane-dense path + bf16 gather), batch=4 -------
    dec_embed_dim2 = 128
    pos_embed2 = get_2d_sincos_pos_embed(dec_embed_dim2, enc_grid)      # (16, 128)
    mask_token2 = get_tokens(k_mt2, dec_embed_dim2, 1)
    embed_token2 = get_tokens(k_et2, dec_embed_dim2, 1)

    batch, n_keep = 4, 8
    xb = jax.random.normal(k_x2, (batch, n_keep, dec_embed_dim2)).astype(jnp.bfloat16)
    enc_mask = _make_mask(k_m2, batch, n_patches, n_keep)
    xv, xm = fwd(xb, enc_mask, pos_embed2, mask_token2, embed_token2)
    jax.block_until_ready((xv, xm))
    rv, rm = decoder_embedding_ref(xb, enc_mask, pos_embed2, mask_token2, embed_token2)
    np.testing.assert_allclose(np.asarray(xv, dtype=np.float32), np.asarray(rv),
                               rtol=3e-2, atol=3e-2)
    np.testing.assert_allclose(np.asarray(xm, dtype=np.float32), np.asarray(rm),
                               rtol=3e-2, atol=3e-2)

    # --- Test 3: float32, no embed_token, batch=5 (exercises batch padding) -----
    batch, n_keep = 5, 8
    x3 = jax.random.normal(k_x3, (batch, n_keep, dec_embed_dim), dtype=jnp.float32)
    enc_mask = _make_mask(k_m3, batch, n_patches, n_keep)
    xv, xm = fwd(x3, enc_mask, pos_embed, mask_token, None)
    jax.block_until_ready((xv, xm))
    rv, rm = decoder_embedding_ref(x3, enc_mask, pos_embed, mask_token, None)
    np.testing.assert_allclose(np.asarray(xv), np.asarray(rv), rtol=1e-5, atol=1e-5)
    np.testing.assert_allclose(np.asarray(xm), np.asarray(rm), rtol=1e-5, atol=1e-5)

    print("KERNEL_OK")
</pallas_src>

<mosaic_0001>
module attributes {stable_mosaic.version = 11 : i64} {
  func.func @_decoder_embed_kernel(%arg0: i32, %arg1: memref<1x8x32xf32, #tpu.memory_space<vmem>>, %arg2: memref<1x1x16xi32, #tpu.memory_space<vmem>>, %arg3: memref<16x32xf32, #tpu.memory_space<vmem>>, %arg4: memref<1x1x32xf32, #tpu.memory_space<vmem>>, %arg5: memref<1x8x32xf32, #tpu.memory_space<vmem>>, %arg6: memref<1x8x32xf32, #tpu.memory_space<vmem>>) attributes {dimension_semantics = [#tpu.dimension_semantics<parallel>], iteration_bounds = array<i64: 2>, scalar_prefetch = 0 : i64, scratch_operands = 0 : i64, tpu.core_type = #tpu.core_type<tc>, window_params = [{transform_indices = @transform_0, window_bounds = array<i64: 1, 8, 32>}, {transform_indices = @transform_1, window_bounds = array<i64: 1, 1, 16>}, {pipeline_mode = #tpu.pipeline_mode<synchronous>, transform_indices = @transform_2, window_bounds = array<i64: 16, 32>}, {pipeline_mode = #tpu.pipeline_mode<synchronous>, transform_indices = @transform_3, window_bounds = array<i64: 1, 1, 32>}, {transform_indices = @transform_4, window_bounds = array<i64: 1, 8, 32>}, {transform_indices = @transform_5, window_bounds = array<i64: 1, 8, 32>}]} {
    %c0 = arith.constant 0 : index
    %c0_0 = arith.constant 0 : index
    %c0_1 = arith.constant 0 : index
    %0 = vector.load %arg2[%c0, %c0_0, %c0_1] : memref<1x1x16xi32, #tpu.memory_space<vmem>>, vector<1x1x16xi32>
    %c0_2 = arith.constant 0 : index
    %c0_3 = arith.constant 0 : index
    %1 = vector.load %arg3[%c0_2, %c0_3] : memref<16x32xf32, #tpu.memory_space<vmem>>, vector<16x32xf32>
    %2 = tpu.iota {dimensions = array<i32: 1>} : vector<1x8x16xi32>
    %3 = vector.broadcast %0 : vector<1x1x16xi32> to vector<1x8x16xi32>
    %4 = arith.cmpi eq, %3, %2 : vector<1x8x16xi32>
    %5 = arith.extui %4 : vector<1x8x16xi1> to vector<1x8x16xi32>
    %6 = arith.sitofp %5 : vector<1x8x16xi32> to vector<1x8x16xf32>
    %7 = vector.shape_cast %6 : vector<1x8x16xf32> to vector<8x16xf32>
    %cst = arith.constant dense<0.000000e+00> : vector<8x32xf32>
    %8 = tpu.matmul %7, %1, %cst {dimension_numbers = #tpu.dot_dimension_numbers<[1], [0], [0], [1], [0, 0, 1, 1], [], []>} : vector<8x16xf32>, vector<16x32xf32>, vector<8x32xf32> -> vector<8x32xf32>
    %9 = vector.shape_cast %8 : vector<8x32xf32> to vector<1x8x32xf32>
    %10 = tpu.iota {dimensions = array<i32: 1>} : vector<1x8x16xi32>
    %c8_i32 = arith.constant 8 : i32
    %11 = vector.broadcast %c8_i32 : i32 to vector<1x8x16xi32>
    %12 = arith.addi %11, %10 : vector<1x8x16xi32>
    %13 = vector.broadcast %0 : vector<1x1x16xi32> to vector<1x8x16xi32>
    %14 = arith.cmpi eq, %13, %12 : vector<1x8x16xi32>
    %15 = arith.extui %14 : vector<1x8x16xi1> to vector<1x8x16xi32>
    %16 = arith.sitofp %15 : vector<1x8x16xi32> to vector<1x8x16xf32>
    %17 = vector.shape_cast %16 : vector<1x8x16xf32> to vector<8x16xf32>
    %cst_4 = arith.constant dense<0.000000e+00> : vector<8x32xf32>
    %18 = tpu.matmul %17, %1, %cst_4 {dimension_numbers = #tpu.dot_dimension_numbers<[1], [0], [0], [1], [0, 0, 1, 1], [], []>} : vector<8x16xf32>, vector<16x32xf32>, vector<8x32xf32> -> vector<8x32xf32>
    %19 = vector.shape_cast %18 : vector<8x32xf32> to vector<1x8x32xf32>
    %c0_5 = arith.constant 0 : index
    %c0_6 = arith.constant 0 : index
    %c0_7 = arith.constant 0 : index
    %20 = vector.load %arg1[%c0_5, %c0_6, %c0_7] : memref<1x8x32xf32, #tpu.memory_space<vmem>>, vector<1x8x32xf32>
    %21 = arith.addf %20, %9 : vector<1x8x32xf32>
    %c0_8 = arith.constant 0 : index
    %c0_9 = arith.constant 0 : index
    %c0_10 = arith.constant 0 : index
    %22 = vector.load %arg5[%c0_8, %c0_9, %c0_10] : memref<1x8x32xf32, #tpu.memory_space<vmem>>, vector<1x8x32xf32>
    tpu.vector_store %arg5[%c0_8, %c0_9, %c0_10], %21 {strides = array<i32>} : memref<1x8x32xf32, #tpu.memory_space<vmem>>, vector<1x8x32xf32>,
    %c0_11 = arith.constant 0 : index
    %c0_12 = arith.constant 0 : index
    %c0_13 = arith.constant 0 : index
    %23 = vector.load %arg4[%c0_11, %c0_12, %c0_13] : memref<1x1x32xf32, #tpu.memory_space<vmem>>, vector<1x1x32xf32>
    %24 = vector.broadcast %23 : vector<1x1x32xf32> to vector<1x8x32xf32>
    %25 = arith.addf %19, %24 : vector<1x8x32xf32>
    %c0_14 = arith.constant 0 : index
    %c0_15 = arith.constant 0 : index
    %c0_16 = arith.constant 0 : index
    %26 = vector.load %arg6[%c0_14, %c0_15, %c0_16] : memref<1x8x32xf32, #tpu.memory_space<vmem>>, vector<1x8x32xf32>
    tpu.vector_store %arg6[%c0_14, %c0_15, %c0_16], %25 {strides = array<i32>} : memref<1x8x32xf32, #tpu.memory_space<vmem>>, vector<1x8x32xf32>,
    return
  }
  func.func @transform_0(%arg0: i32) -> (i32, i32, i32) {
    %c0_i32 = arith.constant 0 : i32
    %c0_i32_0 = arith.constant 0 : i32
    %c0_i32_1 = arith.constant 0 : i32
    return %arg0, %c0_i32, %c0_i32_0 : i32, i32, i32
  }
  func.func @transform_1(%arg0: i32) -> (i32, i32, i32) {
    %c0_i32 = arith.constant 0 : i32
    %c0_i32_0 = arith.constant 0 : i32
    %c0_i32_1 = arith.constant 0 : i32
    return %arg0, %c0_i32, %c0_i32_0 : i32, i32, i32
  }
  func.func @transform_2(%arg0: i32) -> (i32, i32) {
    %c0_i32 = arith.constant 0 : i32
    %c0_i32_0 = arith.constant 0 : i32
    %c0_i32_1 = arith.constant 0 : i32
    return %c0_i32, %c0_i32_0 : i32, i32
  }
  func.func @transform_3(%arg0: i32) -> (i32, i32, i32) {
    %c0_i32 = arith.constant 0 : i32
    %c0_i32_0 = arith.constant 0 : i32
    %c0_i32_1 = arith.constant 0 : i32
    %c0_i32_2 = arith.constant 0 : i32
    return %c0_i32, %c0_i32_0, %c0_i32_1 : i32, i32, i32
  }
  func.func @transform_4(%arg0: i32) -> (i32, i32, i32) {
    %c0_i32 = arith.constant 0 : i32
    %c0_i32_0 = arith.constant 0 : i32
    %c0_i32_1 = arith.constant 0 : i32
    return %arg0, %c0_i32, %c0_i32_0 : i32, i32, i32
  }
  func.func @transform_5(%arg0: i32) -> (i32, i32, i32) {
    %c0_i32 = arith.constant 0 : i32
    %c0_i32_0 = arith.constant 0 : i32
    %c0_i32_1 = arith.constant 0 : i32
    return %arg0, %c0_i32, %c0_i32_0 : i32, i32, i32
  }
}

</mosaic_0001>

<bundles_post_ra>
// kernel: decoder_embedding_forward.1
= control target key start
LH: loop header
LB: loop body
LE: loop exit
PB: predicated region body
PF: predicated region fallthrough
CT: control target
= control target key end

     0   :  { %s766_s0 = inlined_call_operand.vmem [shape: f32[2,8,32], index: 0, kind: input, shape index: {}]   ;;  %s767_s1 = inlined_call_operand.vmem [shape: s32[2,1,16], index: 1, kind: input, shape index: {}]   ;;  %s768_s2 = inlined_call_operand.vmem [shape: f32[16,32], index: 2, kind: input, shape index: {}]   ;;  %s769_s3 = inlined_call_operand.vmem [shape: f32[1,1,32], index: 3, kind: input, shape index: {}]   ;;  %s770_s4 = inlined_call_operand.hbm [shape: f32[2,8,32], index: 4, kind: output, shape index: {0}]   ;;  %s771_s5 = inlined_call_operand.hbm [shape: f32[2,8,32], index: 5, kind: output, shape index: {1}]  }
   0x1   :  { %772 = sst [smem:[#allocation8_spill]] %s767_s1 }
   0x2   :  { %773 = sst [smem:[#allocation9_spill]] %s768_s2 }
   0x3   :  { %11 = vsyncpa [#allocation3], 0 }
   0x4   :  { %13 = vsyncpa [#allocation3 + $0x1], 0 }
   0x5   :  { %14 = vsyncpa [#allocation5], 0 }
   0x6   :  { %16 = vsyncpa [#allocation5 + $0x1], 0  ;;  %s642_s18 = smov 0   ;;  %s644_s19 = smov 0  }
   0x7   :  { %s646_s20 = smov 0   ;;  %s648_s21 = smov 0  }
   0x8 LB: > { %s663_s22 = sadd.s32 4294967295, %s609_s21   ;;  %s451_s23 = sadd.s32 4294967294, %s609_s21   ;;  %s609_s21 = sphi %s648_s21, %s781_s21   ;;  %s605_s20 = sphi %s646_s20, %s780_s20   ;;  %s601_s19 = sphi %s644_s19, %s779_s19   ;;  %s597_s18 = sphi %s642_s18, %s778_s18  }
   0x9   : > { %s667_s24 = sadd.s32 1, %s609_s21   ;;  %s123_s25 = sadd.s32 1, %s605_s20 }
   0xa   : > { %s120_s26 = ssub.s32 %s609_s21, %s667_s24  ;;  %p133_p0 = scmp.ne.s32.totalorder %s605_s20, %s601_s19 }
   0xb   : > { %p121_p1 = scmp.eq.s32.totalorder %s120_s26, 0  ;;  %p134_p2 = scmp.eq.s32.totalorder %s663_s22, 1 }
   0xc   : > { %p139_p3 = scmp.ne.s32.totalorder %s601_s19, %s597_s18  ;;  %p140_p4 = scmp.eq.s32.totalorder %s451_s23, 1 }
   0xd   : > { %s678_s27 = scalar_select %p121_p1, %s605_s20, %s123_s25  }
   0xe   : > { %p680_p5 = por %p134_p2, %p133_p0  ;;  %p684_p6 = por %p140_p4, %p139_p3 }
   0xf   : > { %p454_p7 = scmp.ge.s32.totalorder %s609_s21, 1  ;;  %p203_p8 = scmp.lt.s32.totalorder %s609_s21, 3 }
  0x11   : > { %p204_p9 = pnand %p454_p7, %p203_p8 }
  0x12   : > { %s776_s2 = sld [smem:[#allocation9_spill]] (!%p204_p9)  ;;  %p238_p10 = scmp.lt.s32.totalorder (!%p204_p9), %s663_s22, 1 }
  0x13   : > { %207 = sbr.rel (%p204_p9) target bundleno = 173 (0xad), region = 36  ;;  %s777_s1 = sld [smem:[#allocation8_spill]] (!%p204_p9) }
  0x14   : > { %s702_s13 = sand.u32 (!%p204_p9), 1, %s601_s19   ;;  %s464_s16 = sshll.u32 (!%p204_p9), %s663_s22, 3 }
  0x15   : > { %s455_s14 = sshll.u32 (!%p204_p9), %s702_s13, 3  ;;  %s331_s6 = scalar_lea.hbm (!%p204_p9), %s770_s4, %s464_s16 }
  0x16   : > { %s345_s10 = scalar_lea.hbm (!%p204_p9), %s771_s5, %s464_s16  ;;  %s316_s16 = scalar_lea.sflag (!%p204_p9), [#allocation3], %s702_s13 }
  0x17   : > { %s535_s30 = scalar_lea.hbm (!%p204_p9), %s770_s4, 16 }
  0x18   : > { %v247_v0 = vld [vmem:[%s776_s2 + $0x8] sm:$0xff]  ;;  %v246_v1 = vld [vmem:[%s776_s2] sm:$0xff]  ;;  %v248_v2 = vlaneseq  ;;  %s239_s9 = scalar_select %p238_p10, %s663_s22, 1  ;;  %vm254_vm0 = vcmask 130048   ;;  %v611_v6 = vmov 0.0   ;;  %vm307_vm3 = vcmask 261120  }
  0x19   : > { %272 = vmatpush.msra.mxu0 %v247_v0  ;;  %299 = vmatpush.msra.mxu1 %v247_v0  ;;  %v514_v9 = vld [vmem:[%s769_s3] ss:$0 sm:$0xff]  ;;  %s335_s22 = sshll.u32 %s331_s6, 4  ;;  %s336_s22 = int_to_ptr.hbm [resolvable:$true] %s335_s22 }
  0x1a   : > { %v249_v3 = vshrl.u32 %v248_v2, 7  ;;  %s244_s12 = scalar_lea.vmem %s777_s1, %s239_s9  ;;  %s457_s15 = sshll.u32 %s239_s9, 3 }
  0x1b   : > { %273 = vmatpush.msra.mxu0 %v246_v1  ;;  %300 = vmatpush.msra.mxu1 %v246_v1  ;;  %v513_v5 = vld [vmem:[%s244_s12] ss:$0 sm:$0xff]  ;;  %s241_s25 = scalar_lea.vmem %s766_s0, %s457_s15  ;;  %s230_s1 = scalar_lea.vmem [#allocation2], %s455_s14 }
  0x1c   : > { %v278_v4 = vadd.s32 8, %v249_v3  ;;  %vm251_vm1 = vcmp.eq.s32.totalorder %v513_v5, %v249_v3  ;;  %s333_s2 = sshll.u32 %s230_s1, 4  ;;  %v305_v10 = vld [vmem:[%s241_s25] sm:$0xff]  ;;  %s237_s9 = scalar_lea.vmem [#allocation4], %s455_s14  ;;  %s334_s2 = int_to_ptr.vmem [resolvable:$true] %s333_s2 }
  0x1d   : > { %v458_v7 = vsel %vm251_vm1, 1.0, %v611_v6  ;;  %s347_s17 = sshll.u32 %s237_s9, 4  ;;  %s349_s15 = sshll.u32 %s345_s10, 4  ;;  %s718_s17 = int_to_ptr.vmem [resolvable:$true] %s347_s17  ;;  %s720_s15 = int_to_ptr.hbm [resolvable:$true] %s349_s15 }
  0x1e   : > { %vm279_vm2 = vcmp.eq.s32.totalorder %v513_v5, %v278_v4  ;;  %459 = vmatmul.msk.f32.vlgmr.msra.gmra.mxu0 %vm254_vm0, %v458_v7  ;;  %s529_s23 = sshra.s32 %s336_s22, 4  ;;  %s530_s23 = int_to_ptr.hbm [resolvable:$true] %s529_s23 }
  0x1f   : > { %v460_v8 = vsel %vm279_vm2, 1.0, %v611_v6  ;;  %s531_s14 = scalar_lea.hbm %s530_s23, 8  ;;  %p536_p0 = scmp.lt.s32.totalorder %s530_s23, %s770_s4 }
  0x20   : > { %461 = vmatmul.msk.f32.vlgmr.msra.gmra.mxu1 %vm254_vm0, %v460_v8  ;;  %p532_p11 = scmp.ne.s32.totalorder %s530_s23, %s531_s14  ;;  %p537_p1 = scmp.lt.s32.totalorder %s535_s30, %s531_s14 }
  0x22   : > { %p533_p12 = pnand %p532_p11, %p680_p5  ;;  %p538_p2 = por %p537_p1, %p536_p0 }
  0x24   : > { %p534_p13 = pneg %p533_p12 }
  0x26   : > { %p539_p3 = pnand %p538_p2, %p534_p13 }
  0x9b   : > { %v275_v11 = vpop.f32.mrf.mxu0 }
  0x9c   : > { %v306_v13 = vadd.f32 %v305_v10, %v275_v11 }
  0x9d   : > { %v302_v12 = vpop.f32.mrf.mxu1 }
  0x9e   : > { %v313_v14 = vadd.f32 %v514_v9, %v302_v12  ;;  %308 = vst.msk [vmem:[%s230_s1] sm:$0xff] %vm307_vm3, %v306_v13 }
  0x9f   : > { %542 = shalt.err (!%p539_p3)
}
  0xa0   : > { %468 = dma.vmem_to_hbm [thread:$0]  (%p680_p5), %s334_s2, 128, %s336_s22, %s316_s16   ;;  %314 = vst.msk [vmem:[%s237_s9] sm:$0xff] %vm307_vm3, %v313_v14 }
  0xa1   : > { %s321_s1 = scalar_lea.sflag [#allocation5], %s702_s13  ;;  %s557_s8 = sshra.s32 %s720_s15, 4  ;;  %s558_s8 = int_to_ptr.hbm [resolvable:$true] %s557_s8 }
  0xa2   : > { %s559_s10 = scalar_lea.hbm %s558_s8, 8  ;;  %s563_s23 = scalar_lea.hbm %s771_s5, 16 }
  0xa3   : > { %p560_p4 = scmp.ne.s32.totalorder %s558_s8, %s559_s10  ;;  %p564_p9 = scmp.lt.s32.totalorder %s558_s8, %s771_s5 }
  0xa4   : > { %p565_p10 = scmp.lt.s32.totalorder %s563_s23, %s559_s10 }
  0xa5   : > { %p561_p7 = pnand %p560_p4, %p680_p5 }
  0xa6   : > { %p566_p11 = por %p565_p10, %p564_p9 }
  0xa7   : > { %p562_p8 = pneg %p561_p7 }
  0xa9   : > { %p567_p12 = pnand %p566_p11, %p562_p8 }
  0xab   : > { %570 = shalt.err (!%p567_p12)
}
  0xac   : > { %469 = dma.vmem_to_hbm [thread:$0]  (%p680_p5), %s718_s17, 128, %s720_s15, %s321_s1  }
  0xad PF: > { %p479_p13 = scmp.ge.s32.totalorder %s609_s21, 2  ;;  %s361_s2 = sand.u32 1, %s597_s18  }
  0xae   : > { %s362_s13 = scalar_lea.sflag [#allocation3], %s361_s2 }
  0xaf   : > { %p473_p0 = pnand %p479_p13, %p684_p6 }
  0xb1   : > { %p474_p1 = pneg %p473_p0 }
  0xb3   : > { %588 = dma.done.wait (%p474_p1), %s362_s13, 128  }
  0xb4   : > { %590 = vsyncadd (%p474_p1), %s362_s13, 4294967168  ;;  %s372_s22 = scalar_lea.sflag [#allocation5], %s361_s2 }
  0xb5   : > { %592 = dma.done.wait (%p474_p1), %s372_s22, 128  }
  0xb6   : > { %594 = vsyncadd (%p474_p1), %s372_s22, 4294967168  ;;  %p19_p5 = scmp.ge.s32.totalorder %s667_s24, 4   ;;  %s778_s18 = smov %s601_s19 }
  0xb7   : > { %s779_s19 = smov %s605_s20  ;;  %s780_s20 = smov %s678_s27 }
  0xb8   : > { %s781_s21 = smov %s667_s24  ;;  %21 = sbr.rel (!%p19_p5) target bundleno = 8 (0x8), region = 91 }
  0xbd   :  { %378 = vsyncpa [#allocation3], 1 }
  0xbe   :  { %380 = vsyncpa [#allocation3 + $0x1], 1 }
  0xbf   :  { %381 = vsyncpa [#allocation5], 1 }
  0xc0   :  { %383 = vsyncpa [#allocation5 + $0x1], 1 }

</bundles_post_ra>
